<compile_context>
chip_gen: v6e
topology: v6e:2x2x1
jax: 0.10.0
libtpu: 0.0.40
codegen_flags: <defaults>
</compile_context>

<pallas_src>
import functools

import jax
import jax.numpy as jnp
import numpy as np
from jax.experimental import pallas as pl
from jax.experimental.pallas import tpu as pltpu

EPS = 1e-5


def dlfsr_kernel(x_ref,
                 w1_ref, b1_ref, g1_ref, be1_ref,
                 w2_ref, b2_ref, g2_ref, be2_ref,
                 w3_ref, b3_ref, g3_ref, be3_ref,
                 w4_ref, b4_ref,
                 o_ref, *, approx_recip=True):
    def linear_relu(h, w_ref, b_ref):
        # Cast activations to the weight dtype only at the MXU boundary
        # (bf16 operands, f32 accumulation); bias + ReLU stay in f32.
        z = jnp.dot(h.astype(w_ref.dtype), w_ref[...],
                    preferred_element_type=jnp.float32) + b_ref[...]
        return jnp.maximum(z, 0.0)

    def batchnorm(h, g_ref, be_ref):
        # Training-mode BatchNorm1d with centered two-pass statistics
        # (numerically safe for post-ReLU activations with mean >> std),
        # folded into a single scale/shift FMA per element.
        inv_n = 1.0 / h.shape[0]
        mu = jnp.sum(h, axis=0, keepdims=True) * inv_n
        d = h - mu
        var = jnp.sum(d * d, axis=0, keepdims=True) * inv_n   # biased variance
        scale = g_ref[...] * jax.lax.rsqrt(var + EPS)
        return d * scale + be_ref[...]

    h = x_ref[...]
    h = batchnorm(linear_relu(h, w1_ref, b1_ref), g1_ref, be1_ref)
    h = batchnorm(linear_relu(h, w2_ref, b2_ref), g2_ref, be2_ref)
    h = batchnorm(linear_relu(h, w3_ref, b3_ref), g3_ref, be3_ref)
    z = linear_relu(h, w4_ref, b4_ref)                 # [B, 2] post-ReLU logits

    # 2-class softmax in sigmoid form: p0 = 1 / (1 + exp(z1 - z0)), p1 = 1 - p0.
    # (exp(+inf) -> p0 = 0 is the correct limit, so this is overflow-safe and
    # needs no cross-lane max/sum reductions.)
    d = z[:, 1:2] - z[:, 0:1]
    denom = 1.0 + jnp.exp(d)
    if approx_recip:
        p0 = pl.reciprocal(denom, approx=True)   # EUP slot, free next to the exp
    else:
        p0 = 1.0 / denom                         # exact path for strict checks
    o_ref[:, 0:1] = p0
    o_ref[:, 1:2] = 1.0 - p0


def prepare_params(params, compute_dtype=jnp.bfloat16):
    """One-time weight prep (hoisted out of the per-call path).

    Linear weights are stored (in, out) and cast once to the MXU compute dtype
    (bf16 by default: full-rate MXU on v5e/v6e/v7x, half the weight bytes).
    Biases / BN affine params stay f32 (all VPU/EUP math is f32, v5e-safe).
    """
    (w1, b1, g1, be1, w2, b2, g2, be2, w3, b3, g3, be3, w4, b4) = params
    w1, w2, w3, w4 = (jnp.asarray(w, compute_dtype) for w in (w1, w2, w3, w4))
    return (w1, b1, g1, be1, w2, b2, g2, be2, w3, b3, g3, be3, w4, b4)


def _vmem_limit_bytes(args, B, H):
    # Live set: all operands + a handful of [B, H] f32 temporaries + output.
    est = sum(int(a.size) * a.dtype.itemsize for a in args)
    est += 6 * B * H * 4 + B * 2 * 4
    try:
        phys = int(pltpu.get_tpu_info().vmem_capacity_bytes)
    except Exception:  # interpret mode / older runtimes
        phys = 64 * 1024 * 1024
    cap = phys - 8 * 1024 * 1024        # headroom for Mosaic internal scratch
    if est > cap:
        # TODO(synk): fall back to a batch-tiled grid with cross-tile BN stats
        # instead of failing once that path exists.
        raise NotImplementedError(
            f"DLFSR whole-batch working set ({est} B) exceeds per-core VMEM "
            f"budget ({cap} B); batch-tiled BN path not implemented yet.")
    return int(min(max(2 * est, 32 * 1024 * 1024), cap)), est


def dlfsr_forward(x, prepared_params, *, approx_recip=True):
    """x: [B, input_size] f32; prepared_params from `prepare_params`."""
    B, F = x.shape
    w1 = prepared_params[0]
    H = w1.shape[1]
    args = (x,) + tuple(prepared_params)

    vmem_limit, est_bytes = _vmem_limit_bytes(args, B, H)

    flops = 2 * B * (F * H + 2 * H * H + 2 * H) + 20 * B * H
    cost = pl.CostEstimate(flops=int(flops),
                           transcendentals=int(B + 3 * H),
                           bytes_accessed=int(est_bytes))

    kernel = functools.partial(dlfsr_kernel, approx_recip=approx_recip)
    vmem = pl.BlockSpec(memory_space=pltpu.MemorySpace.VMEM)
    return pl.pallas_call(
        kernel,
        out_shape=jax.ShapeDtypeStruct((B, 2), jnp.float32),
        in_specs=[vmem] * len(args),
        out_specs=vmem,
        compiler_params=pltpu.CompilerParams(vmem_limit_bytes=vmem_limit),
        cost_estimate=cost,
    )(*args)


def init_params(key, input_size):
    """Deterministic synthetic params. Linear weights stored as (in, out)."""
    H = 2 * input_size
    dims = [(input_size, H), (H, H), (H, H), (H, 2)]
    params = []
    for i, (fin, fout) in enumerate(dims):
        kw, kb, key = jax.random.split(key, 3)
        bound = 1.0 / np.sqrt(fin)
        w = jax.random.uniform(kw, (fin, fout), jnp.float32, -bound, bound)
        b = jax.random.uniform(kb, (1, fout), jnp.float32, -bound, bound)
        params.append((w, b))
        if i < 3:  # batchnorm after first three layers
            kg, kbeta, key = jax.random.split(key, 3)
            gamma = 1.0 + 0.1 * jax.random.normal(kg, (1, H), jnp.float32)
            beta = 0.1 * jax.random.normal(kbeta, (1, H), jnp.float32)
            params.append((gamma, beta))
    flat = []
    for pair in params:
        flat.extend(pair)
    return tuple(flat)


def reference_forward(x, params, compute_dtype=jnp.float32):
    """PyTorch-faithful JAX reference (training-mode BN, softmax); optional
    bf16 cast at the matmul boundary to mirror the kernel's fast path."""
    (w1, b1, g1, be1, w2, b2, g2, be2, w3, b3, g3, be3, w4, b4) = params

    def lin_relu(h, w, b):
        z = jnp.dot(h.astype(compute_dtype), w.astype(compute_dtype),
                    preferred_element_type=jnp.float32) + b
        return jnp.maximum(z, 0.0)

    def bn(h, g, be):
        mu = jnp.mean(h, axis=0, keepdims=True)
        var = jnp.mean((h - mu) ** 2, axis=0, keepdims=True)
        return (h - mu) / jnp.sqrt(var + EPS) * g + be

    h = bn(lin_relu(x, w1, b1), g1, be1)
    h = bn(lin_relu(h, w2, b2), g2, be2)
    h = bn(lin_relu(h, w3, b3), g3, be3)
    z = lin_relu(h, w4, b4)
    return jax.nn.softmax(z, axis=-1)


if __name__ == "__main__":
    B = 8
    input_size = 32

    key = jax.random.PRNGKey(0)
    kx, kp = jax.random.split(key)
    x = jax.random.normal(kx, (B, input_size), jnp.float32)
    params = init_params(kp, input_size)

    # 1) strict semantics check: f32 MXU operands, exact reciprocal.
    p_f32 = prepare_params(params, jnp.float32)
    out_f32 = jax.block_until_ready(dlfsr_forward(x, p_f32, approx_recip=False))
    ref_f32 = jax.block_until_ready(reference_forward(x, params, jnp.float32))
    assert out_f32.shape == (B, 2)
    np.testing.assert_allclose(np.asarray(out_f32), np.asarray(ref_f32),
                               rtol=1e-4, atol=1e-4)

    # 2) default fast path: bf16 MXU operands + EUP reciprocal, checked against
    #    a bf16-matched reference (same dot-boundary casts, f32 accumulation).
    p_bf16 = prepare_params(params, jnp.bfloat16)
    out_bf16 = jax.block_until_ready(dlfsr_forward(x, p_bf16))
    ref_bf16 = jax.block_until_ready(reference_forward(x, params, jnp.bfloat16))
    assert out_bf16.shape == (B, 2)
    np.testing.assert_allclose(np.asarray(out_bf16).sum(axis=-1), np.ones(B),
                               rtol=1e-5, atol=1e-5)
    np.testing.assert_allclose(np.asarray(out_bf16), np.asarray(ref_bf16),
                               rtol=5e-2, atol=5e-2)

    print("KERNEL_OK")
</pallas_src>

<mosaic_0001>
module attributes {stable_mosaic.version = 11 : i64} {
  func.func @dlfsr_kernel(%arg0: memref<8x32xf32, #tpu.memory_space<vmem>>, %arg1: memref<32x64xf32, #tpu.memory_space<vmem>>, %arg2: memref<1x64xf32, #tpu.memory_space<vmem>>, %arg3: memref<1x64xf32, #tpu.memory_space<vmem>>, %arg4: memref<1x64xf32, #tpu.memory_space<vmem>>, %arg5: memref<64x64xf32, #tpu.memory_space<vmem>>, %arg6: memref<1x64xf32, #tpu.memory_space<vmem>>, %arg7: memref<1x64xf32, #tpu.memory_space<vmem>>, %arg8: memref<1x64xf32, #tpu.memory_space<vmem>>, %arg9: memref<64x64xf32, #tpu.memory_space<vmem>>, %arg10: memref<1x64xf32, #tpu.memory_space<vmem>>, %arg11: memref<1x64xf32, #tpu.memory_space<vmem>>, %arg12: memref<1x64xf32, #tpu.memory_space<vmem>>, %arg13: memref<64x2xf32, #tpu.memory_space<vmem>>, %arg14: memref<1x2xf32, #tpu.memory_space<vmem>>, %arg15: memref<8x2xf32, #tpu.memory_space<vmem>>) attributes {dimension_semantics = [], scalar_prefetch = 0 : i64, scratch_operands = 0 : i64, tpu.core_type = #tpu.core_type<tc>} {
    %c0 = arith.constant 0 : index
    %c0_0 = arith.constant 0 : index
    %0 = vector.load %arg0[%c0, %c0_0] : memref<8x32xf32, #tpu.memory_space<vmem>>, vector<8x32xf32>
    %c0_1 = arith.constant 0 : index
    %c0_2 = arith.constant 0 : index
    %1 = vector.load %arg1[%c0_1, %c0_2] : memref<32x64xf32, #tpu.memory_space<vmem>>, vector<32x64xf32>
    %cst = arith.constant dense<0.000000e+00> : vector<8x64xf32>
    %2 = tpu.matmul %0, %1, %cst {dimension_numbers = #tpu.dot_dimension_numbers<[1], [0], [0], [1], [0, 0, 1, 1], [], []>} : vector<8x32xf32>, vector<32x64xf32>, vector<8x64xf32> -> vector<8x64xf32>
    %c0_3 = arith.constant 0 : index
    %c0_4 = arith.constant 0 : index
    %3 = vector.load %arg2[%c0_3, %c0_4] : memref<1x64xf32, #tpu.memory_space<vmem>>, vector<1x64xf32>
    %4 = vector.broadcast %3 : vector<1x64xf32> to vector<8x64xf32>
    %5 = arith.addf %2, %4 : vector<8x64xf32>
    %cst_5 = arith.constant 0.000000e+00 : f32
    %6 = vector.broadcast %cst_5 : f32 to vector<8x64xf32>
    %7 = arith.maximumf %5, %6 : vector<8x64xf32>
    %cst_6 = arith.constant dense<0.000000e+00> : vector<64xf32>
    %8 = vector.multi_reduction <add>, %7, %cst_6 [0] : vector<8x64xf32> to vector<64xf32>
    %9 = vector.shape_cast %8 : vector<64xf32> to vector<1x64xf32>
    %cst_7 = arith.constant 1.250000e-01 : f32
    %10 = vector.broadcast %cst_7 : f32 to vector<1x64xf32>
    %11 = arith.mulf %9, %10 : vector<1x64xf32>
    %12 = vector.broadcast %11 : vector<1x64xf32> to vector<8x64xf32>
    %13 = arith.subf %7, %12 : vector<8x64xf32>
    %14 = arith.mulf %13, %13 : vector<8x64xf32>
    %cst_8 = arith.constant dense<0.000000e+00> : vector<64xf32>
    %15 = vector.multi_reduction <add>, %14, %cst_8 [0] : vector<8x64xf32> to vector<64xf32>
    %16 = vector.shape_cast %15 : vector<64xf32> to vector<1x64xf32>
    %cst_9 = arith.constant 1.250000e-01 : f32
    %17 = vector.broadcast %cst_9 : f32 to vector<1x64xf32>
    %18 = arith.mulf %16, %17 : vector<1x64xf32>
    %c0_10 = arith.constant 0 : index
    %c0_11 = arith.constant 0 : index
    %19 = vector.load %arg3[%c0_10, %c0_11] : memref<1x64xf32, #tpu.memory_space<vmem>>, vector<1x64xf32>
    %cst_12 = arith.constant 9.99999974E-6 : f32
    %20 = vector.broadcast %cst_12 : f32 to vector<1x64xf32>
    %21 = arith.addf %18, %20 : vector<1x64xf32>
    %22 = math.rsqrt %21 : vector<1x64xf32>
    %23 = arith.mulf %19, %22 : vector<1x64xf32>
    %24 = vector.broadcast %23 : vector<1x64xf32> to vector<8x64xf32>
    %25 = arith.mulf %13, %24 : vector<8x64xf32>
    %c0_13 = arith.constant 0 : index
    %c0_14 = arith.constant 0 : index
    %26 = vector.load %arg4[%c0_13, %c0_14] : memref<1x64xf32, #tpu.memory_space<vmem>>, vector<1x64xf32>
    %27 = vector.broadcast %26 : vector<1x64xf32> to vector<8x64xf32>
    %28 = arith.addf %25, %27 : vector<8x64xf32>
    %c0_15 = arith.constant 0 : index
    %c0_16 = arith.constant 0 : index
    %29 = vector.load %arg5[%c0_15, %c0_16] : memref<64x64xf32, #tpu.memory_space<vmem>>, vector<64x64xf32>
    %cst_17 = arith.constant dense<0.000000e+00> : vector<8x64xf32>
    %30 = tpu.matmul %28, %29, %cst_17 {dimension_numbers = #tpu.dot_dimension_numbers<[1], [0], [0], [1], [0, 0, 1, 1], [], []>} : vector<8x64xf32>, vector<64x64xf32>, vector<8x64xf32> -> vector<8x64xf32>
    %c0_18 = arith.constant 0 : index
    %c0_19 = arith.constant 0 : index
    %31 = vector.load %arg6[%c0_18, %c0_19] : memref<1x64xf32, #tpu.memory_space<vmem>>, vector<1x64xf32>
    %32 = vector.broadcast %31 : vector<1x64xf32> to vector<8x64xf32>
    %33 = arith.addf %30, %32 : vector<8x64xf32>
    %cst_20 = arith.constant 0.000000e+00 : f32
    %34 = vector.broadcast %cst_20 : f32 to vector<8x64xf32>
    %35 = arith.maximumf %33, %34 : vector<8x64xf32>
    %cst_21 = arith.constant dense<0.000000e+00> : vector<64xf32>
    %36 = vector.multi_reduction <add>, %35, %cst_21 [0] : vector<8x64xf32> to vector<64xf32>
    %37 = vector.shape_cast %36 : vector<64xf32> to vector<1x64xf32>
    %cst_22 = arith.constant 1.250000e-01 : f32
    %38 = vector.broadcast %cst_22 : f32 to vector<1x64xf32>
    %39 = arith.mulf %37, %38 : vector<1x64xf32>
    %40 = vector.broadcast %39 : vector<1x64xf32> to vector<8x64xf32>
    %41 = arith.subf %35, %40 : vector<8x64xf32>
    %42 = arith.mulf %41, %41 : vector<8x64xf32>
    %cst_23 = arith.constant dense<0.000000e+00> : vector<64xf32>
    %43 = vector.multi_reduction <add>, %42, %cst_23 [0] : vector<8x64xf32> to vector<64xf32>
    %44 = vector.shape_cast %43 : vector<64xf32> to vector<1x64xf32>
    %cst_24 = arith.constant 1.250000e-01 : f32
    %45 = vector.broadcast %cst_24 : f32 to vector<1x64xf32>
    %46 = arith.mulf %44, %45 : vector<1x64xf32>
    %c0_25 = arith.constant 0 : index
    %c0_26 = arith.constant 0 : index
    %47 = vector.load %arg7[%c0_25, %c0_26] : memref<1x64xf32, #tpu.memory_space<vmem>>, vector<1x64xf32>
    %cst_27 = arith.constant 9.99999974E-6 : f32
    %48 = vector.broadcast %cst_27 : f32 to vector<1x64xf32>
    %49 = arith.addf %46, %48 : vector<1x64xf32>
    %50 = math.rsqrt %49 : vector<1x64xf32>
    %51 = arith.mulf %47, %50 : vector<1x64xf32>
    %52 = vector.broadcast %51 : vector<1x64xf32> to vector<8x64xf32>
    %53 = arith.mulf %41, %52 : vector<8x64xf32>
    %c0_28 = arith.constant 0 : index
    %c0_29 = arith.constant 0 : index
    %54 = vector.load %arg8[%c0_28, %c0_29] : memref<1x64xf32, #tpu.memory_space<vmem>>, vector<1x64xf32>
    %55 = vector.broadcast %54 : vector<1x64xf32> to vector<8x64xf32>
    %56 = arith.addf %53, %55 : vector<8x64xf32>
    %c0_30 = arith.constant 0 : index
    %c0_31 = arith.constant 0 : index
    %57 = vector.load %arg9[%c0_30, %c0_31] : memref<64x64xf32, #tpu.memory_space<vmem>>, vector<64x64xf32>
    %cst_32 = arith.constant dense<0.000000e+00> : vector<8x64xf32>
    %58 = tpu.matmul %56, %57, %cst_32 {dimension_numbers = #tpu.dot_dimension_numbers<[1], [0], [0], [1], [0, 0, 1, 1], [], []>} : vector<8x64xf32>, vector<64x64xf32>, vector<8x64xf32> -> vector<8x64xf32>
    %c0_33 = arith.constant 0 : index
    %c0_34 = arith.constant 0 : index
    %59 = vector.load %arg10[%c0_33, %c0_34] : memref<1x64xf32, #tpu.memory_space<vmem>>, vector<1x64xf32>
    %60 = vector.broadcast %59 : vector<1x64xf32> to vector<8x64xf32>
    %61 = arith.addf %58, %60 : vector<8x64xf32>
    %cst_35 = arith.constant 0.000000e+00 : f32
    %62 = vector.broadcast %cst_35 : f32 to vector<8x64xf32>
    %63 = arith.maximumf %61, %62 : vector<8x64xf32>
    %cst_36 = arith.constant dense<0.000000e+00> : vector<64xf32>
    %64 = vector.multi_reduction <add>, %63, %cst_36 [0] : vector<8x64xf32> to vector<64xf32>
    %65 = vector.shape_cast %64 : vector<64xf32> to vector<1x64xf32>
    %cst_37 = arith.constant 1.250000e-01 : f32
    %66 = vector.broadcast %cst_37 : f32 to vector<1x64xf32>
    %67 = arith.mulf %65, %66 : vector<1x64xf32>
    %68 = vector.broadcast %67 : vector<1x64xf32> to vector<8x64xf32>
    %69 = arith.subf %63, %68 : vector<8x64xf32>
    %70 = arith.mulf %69, %69 : vector<8x64xf32>
    %cst_38 = arith.constant dense<0.000000e+00> : vector<64xf32>
    %71 = vector.multi_reduction <add>, %70, %cst_38 [0] : vector<8x64xf32> to vector<64xf32>
    %72 = vector.shape_cast %71 : vector<64xf32> to vector<1x64xf32>
    %cst_39 = arith.constant 1.250000e-01 : f32
    %73 = vector.broadcast %cst_39 : f32 to vector<1x64xf32>
    %74 = arith.mulf %72, %73 : vector<1x64xf32>
    %c0_40 = arith.constant 0 : index
    %c0_41 = arith.constant 0 : index
    %75 = vector.load %arg11[%c0_40, %c0_41] : memref<1x64xf32, #tpu.memory_space<vmem>>, vector<1x64xf32>
    %cst_42 = arith.constant 9.99999974E-6 : f32
    %76 = vector.broadcast %cst_42 : f32 to vector<1x64xf32>
    %77 = arith.addf %74, %76 : vector<1x64xf32>
    %78 = math.rsqrt %77 : vector<1x64xf32>
    %79 = arith.mulf %75, %78 : vector<1x64xf32>
    %80 = vector.broadcast %79 : vector<1x64xf32> to vector<8x64xf32>
    %81 = arith.mulf %69, %80 : vector<8x64xf32>
    %c0_43 = arith.constant 0 : index
    %c0_44 = arith.constant 0 : index
    %82 = vector.load %arg12[%c0_43, %c0_44] : memref<1x64xf32, #tpu.memory_space<vmem>>, vector<1x64xf32>
    %83 = vector.broadcast %82 : vector<1x64xf32> to vector<8x64xf32>
    %84 = arith.addf %81, %83 : vector<8x64xf32>
    %c0_45 = arith.constant 0 : index
    %c0_46 = arith.constant 0 : index
    %85 = vector.load %arg13[%c0_45, %c0_46] : memref<64x2xf32, #tpu.memory_space<vmem>>, vector<64x2xf32>
    %cst_47 = arith.constant dense<0.000000e+00> : vector<8x2xf32>
    %86 = tpu.matmul %84, %85, %cst_47 {dimension_numbers = #tpu.dot_dimension_numbers<[1], [0], [0], [1], [0, 0, 1, 1], [], []>} : vector<8x64xf32>, vector<64x2xf32>, vector<8x2xf32> -> vector<8x2xf32>
    %c0_48 = arith.constant 0 : index
    %c0_49 = arith.constant 0 : index
    %87 = vector.load %arg14[%c0_48, %c0_49] : memref<1x2xf32, #tpu.memory_space<vmem>>, vector<1x2xf32>
    %88 = vector.broadcast %87 : vector<1x2xf32> to vector<8x2xf32>
    %89 = arith.addf %86, %88 : vector<8x2xf32>
    %cst_50 = arith.constant 0.000000e+00 : f32
    %90 = vector.broadcast %cst_50 : f32 to vector<8x2xf32>
    %91 = arith.maximumf %89, %90 : vector<8x2xf32>
    %92 = vector.extract_strided_slice %91 {offsets = [0, 1], sizes = [8, 1], strides = [1, 1]} : vector<8x2xf32> to vector<8x1xf32>
    %93 = vector.extract_strided_slice %91 {offsets = [0, 0], sizes = [8, 1], strides = [1, 1]} : vector<8x2xf32> to vector<8x1xf32>
    %94 = arith.subf %92, %93 : vector<8x1xf32>
    %95 = math.exp %94 : vector<8x1xf32>
    %cst_51 = arith.constant 1.000000e+00 : f32
    %96 = vector.broadcast %cst_51 : f32 to vector<8x1xf32>
    %97 = arith.addf %96, %95 : vector<8x1xf32>
    %cst_52 = arith.constant 1.000000e+00 : f32
    %98 = vector.broadcast %cst_52 : f32 to vector<8x1xf32>
    %99 = arith.divf %98, %97 : vector<8x1xf32>
    %c0_53 = arith.constant 0 : index
    %c0_54 = arith.constant 0 : index
    %100 = vector.load %arg15[%c0_53, %c0_54] : memref<8x2xf32, #tpu.memory_space<vmem>>, vector<8x1xf32>
    tpu.vector_store %arg15[%c0_53, %c0_54], %99 {strides = array<i32>} : memref<8x2xf32, #tpu.memory_space<vmem>>, vector<8x1xf32>,
    %cst_55 = arith.constant 1.000000e+00 : f32
    %101 = vector.broadcast %cst_55 : f32 to vector<8x1xf32>
    %102 = arith.subf %101, %99 : vector<8x1xf32>
    %c0_56 = arith.constant 0 : index
    %c1 = arith.constant 1 : index
    %103 = vector.load %arg15[%c0_56, %c1] : memref<8x2xf32, #tpu.memory_space<vmem>>, vector<8x1xf32>
    tpu.vector_store %arg15[%c0_56, %c1], %102 {strides = array<i32>} : memref<8x2xf32, #tpu.memory_space<vmem>>, vector<8x1xf32>,
    return
  }
}

</mosaic_0001>

<bundles_post_ra>
// kernel: tpu_custom_call.1
= control target key start
LH: loop header
LB: loop body
LE: loop exit
PB: predicated region body
PF: predicated region fallthrough
CT: control target
= control target key end

     0   :  { %20 = vsyncpa [#allocation3], 0  ;;  %s1043_s0 = inlined_call_operand.vmem [shape: f32[8,32], index: 0, kind: input, shape index: {}]   ;;  %s1044_s1 = inlined_call_operand.hbm [shape: f32[32,64], index: 1, kind: input, shape index: {}]   ;;  %s1045_s2 = inlined_call_operand.vmem [shape: f32[1,64], index: 2, kind: input, shape index: {}]   ;;  %s1046_s3 = inlined_call_operand.vmem [shape: f32[1,64], index: 3, kind: input, shape index: {}]   ;;  %s1047_s4 = inlined_call_operand.hbm [shape: f32[1,64], index: 4, kind: input, shape index: {}]   ;;  %s1048_s5 = inlined_call_operand.vmem [shape: f32[64,64], index: 5, kind: input, shape index: {}]   ;;  %s1049_s6 = inlined_call_operand.hbm [shape: f32[1,64], index: 6, kind: input, shape index: {}]   ;;  %s1050_s7 = inlined_call_operand.vmem [shape: f32[1,64], index: 7, kind: input, shape index: {}]   ;;  %s1051_s8 = inlined_call_operand.vmem [shape: f32[1,64], index: 8, kind: input, shape index: {}]   ;;  %s1052_s9 = inlined_call_operand.hbm [shape: f32[64,64], index: 9, kind: input, shape index: {}]   ;;  %s1053_s10 = inlined_call_operand.vmem [shape: f32[1,64], index: 10, kind: input, shape index: {}]   ;;  %s1054_s11 = inlined_call_operand.vmem [shape: f32[1,64], index: 11, kind: input, shape index: {}]   ;;  %s1055_s12 = inlined_call_operand.vmem [shape: f32[1,64], index: 12, kind: input, shape index: {}]   ;;  %s1056_s13 = inlined_call_operand.vmem [shape: f32[64,2], index: 13, kind: input, shape index: {}]   ;;  %s1057_s14 = inlined_call_operand.vmem [shape: f32[1,2], index: 14, kind: input, shape index: {}]   ;;  %s1058_s15 = inlined_call_operand.vmem [shape: f32[8,2], index: 15, kind: output, shape index: {}]  }
   0x1   :  { %21 = vsyncpa [#allocation5], 0 }
   0x2   :  { %22 = vsyncpa [#allocation8], 0  ;;  %s810_s18 = smov [#allocation4]   ;;  %s811_s20 = smov [#allocation2]  }
   0x3   :  { %s47_s19 = sshll.u32 %s810_s18, 4  ;;  %s30_s21 = sshll.u32 %s811_s20, 4  ;;  %s48_s19 = int_to_ptr.vmem [resolvable:$true] %s47_s19  ;;  %s31_s21 = int_to_ptr.vmem [resolvable:$true] %s30_s21 }
   0x4   :  { %s732_s22 = scalar_lea.vmem %s48_s19, 16  ;;  %s736_s23 = scalar_lea.vmem %s48_s19, 32 }
   0x5   :  { %p733_p0 = scmp.ne.s32.totalorder %s48_s19, %s732_s22  ;;  %p737_p1 = scmp.lt.s32.totalorder %s48_s19, %s48_s19 }
   0x6   :  { %p738_p2 = scmp.lt.s32.totalorder %s736_s23, %s732_s22 }
   0x8   :  { %p739_p3 = por %p738_p2, %p737_p1 }
   0xa   :  { %p740_p4 = pnand %p739_p3, %p733_p0 }
   0xc   :  { %743 = shalt.err (!%p740_p4)
}
   0xd   :  { %50 = dma.hbm_to_vmem [thread:$0]  %s1047_s4, 16, %s48_s19, [#allocation5]  }
   0xe   :  { %s752_s26 = scalar_lea.vmem %s31_s21, 512  ;;  %p757_p6 = scmp.lt.s32.totalorder %s31_s21, %s31_s21 }
   0xf   :  { %p753_p5 = scmp.ne.s32.totalorder %s31_s21, %s752_s26  ;;  %p758_p7 = scmp.lt.s32.totalorder %s752_s26, %s752_s26 }
  0x11   :  { %p759_p8 = por %p758_p7, %p757_p6 }
  0x13   :  { %p760_p9 = pnand %p759_p8, %p753_p5 }
  0x15   :  { %763 = shalt.err (!%p760_p9)
}
  0x16   :  { %s812_s27 = smov 128   ;;  %s813_s28 = smov 8  }
  0x17   :  { %36 = dma.hbm_to_vmem [thread:$0]  %s1044_s1, 512, %s31_s21, [#allocation3], %s812_s27, %s812_s27, %s813_s28  }
  0x18   :  { %s814_s16 = smov [#allocation6]   ;;  %s815_s18 = smov [#allocation7]  }
  0x19   :  { %s59_s17 = sshll.u32 %s814_s16, 4  ;;  %s72_s20 = sshll.u32 %s815_s18, 4  ;;  %s60_s17 = int_to_ptr.vmem [resolvable:$true] %s59_s17  ;;  %s73_s20 = int_to_ptr.vmem [resolvable:$true] %s72_s20 }
  0x1a   :  { %s772_s4 = scalar_lea.vmem %s60_s17, 16  ;;  %s776_s19 = scalar_lea.vmem %s60_s17, 32 }
  0x1b   :  { %p773_p10 = scmp.ne.s32.totalorder %s60_s17, %s772_s4  ;;  %p777_p11 = scmp.lt.s32.totalorder %s60_s17, %s60_s17 }
  0x1c   :  { %p778_p12 = scmp.lt.s32.totalorder %s776_s19, %s772_s4 }
  0x1e   :  { %p779_p13 = por %p778_p12, %p777_p11 }
  0x20   :  { %p780_p0 = pnand %p779_p13, %p773_p10 }
  0x22   :  { %783 = shalt.err (!%p780_p0)
}
  0x23   :  { %62 = dma.hbm_to_vmem [thread:$0]  %s1049_s6, 16, %s60_s17, [#allocation5]  }
  0x24   :  { %s792_s24 = scalar_lea.vmem %s73_s20, 1024  ;;  %p797_p2 = scmp.lt.s32.totalorder %s73_s20, %s73_s20 }
  0x25   :  { %p793_p1 = scmp.ne.s32.totalorder %s73_s20, %s792_s24  ;;  %p798_p3 = scmp.lt.s32.totalorder %s792_s24, %s792_s24 }
  0x27   :  { %p799_p4 = por %p798_p3, %p797_p2 }
  0x29   :  { %p800_p5 = pnand %p799_p4, %p793_p1 }
  0x2b   :  { %803 = shalt.err (!%p800_p5)
}
  0x2c   :  { %78 = dma.hbm_to_vmem [thread:$0]  %s1052_s9, 1024, %s73_s20, [#allocation8], %s812_s27, %s812_s27, %s813_s28  }
  0x2d   :  { %804 = dma.done.wait [#allocation3], 512  }
  0x2e   :  { %805 = vsyncadd [#allocation3], 4294966784 }
  0x2f   :  { %806 = dma.done.wait [#allocation5], 32  }
  0x30   :  { %807 = vsyncadd [#allocation5], 4294967264 }
  0x31   :  { %808 = dma.done.wait [#allocation8], 1024  }
  0x32   :  { %809 = vsyncadd [#allocation8], 4294966272  ;;  %v816_v0 = vmov 0.0   ;;  %vm817_vm0 = vmmov 0   ;;  %v105_v1 = vld [vmem:[#allocation2 + $0x18] sm:$0xff]  ;;  %v104_v2 = vld [vmem:[#allocation2 + $0x10] sm:$0xff]  ;;  %v212_v38 = vlaneseq }
  0x33   :  { %636 = vmatprep.subr.mxu0 %v816_v0  ;;  %644 = vmatprep.mubr.msk.f32.mxu0 %vm817_vm0, %v816_v0  ;;  %v103_v3 = vld [vmem:[#allocation2 + $0x8] sm:$0xff]  ;;  %v102_v4 = vld [vmem:[#allocation2] sm:$0xff]  ;;  %vm113_vm1 = vcmask 261120   ;;  %v233_v6 = vld [vmem:[%s1048_s5 + $0x38] sm:$0xff]  ;;  %vm188_vm2 = vcmask 523264   ;;  %vm581_vm3 = vcmask 7168  }
  0x34   :  { %647 = vmatprep.subr.mxu1 %v816_v0  ;;  %663 = vmatprep.mubr.msk.f32.mxu1 %vm817_vm0, %v816_v0  ;;  %v101_v5 = vld [vmem:[%s1043_s0] sm:$0xff]  ;;  %v232_v7 = vld [vmem:[%s1048_s5 + $0x30] sm:$0xff]  ;;  %v231_v8 = vld [vmem:[%s1048_s5 + $0x28] sm:$0xff]  ;;  %v213_v39 = vshrl.u32 %v212_v38, 7  ;;  %vm584_vm4 = vcmask 15368  }
  0x35   :  { %637 = vmatpush3.msra.mxu0 %v105_v1  ;;  %648 = vmatpush3.msra.mxu1 %v233_v6  ;;  %v230_v9 = vld [vmem:[%s1048_s5 + $0x20] sm:$0xff]  ;;  %v229_v10 = vld [vmem:[%s1048_s5 + $0x18] sm:$0xff]  ;;  %v228_v11 = vld [vmem:[%s1048_s5 + $0x10] sm:$0xff] }
  0x36   :  { %638 = vmatprep.subr.mxu0 %v816_v0  ;;  %649 = vmatprep.subr.mxu1 %v816_v0  ;;  %v227_v12 = vld [vmem:[%s1048_s5 + $0x8] sm:$0xff]  ;;  %v226_v13 = vld [vmem:[%s1048_s5] sm:$0xff]  ;;  %v967_v41 = vsub.s32 0, %v213_v39  ;;  %v358_v49 = vld [vmem:[#allocation7 + $0x30] sm:$0xff] }
  0x37   :  { %639 = vmatpush3.msra.mxu0 %v104_v2  ;;  %650 = vmatpush3.msra.mxu1 %v232_v7  ;;  %v593_v14 = vld [vmem:[%s1045_s2] ss:$0 sm:$0xff]  ;;  %v357_v50 = vld [vmem:[#allocation7 + $0x28] sm:$0xff]  ;;  %v356_v51 = vld [vmem:[#allocation7 + $0x20] sm:$0xff] }
  0x38   :  { %640 = vmatprep.subr.mxu0 %v816_v0  ;;  %651 = vmatprep.subr.mxu1 %v816_v0  ;;  %v207_v40 = vld [vmem:[%s1046_s3] sm:$0x1]  ;;  %v354_v53 = vld [vmem:[#allocation7 + $0x10] sm:$0xff]  ;;  %v353_v54 = vld [vmem:[#allocation7 + $0x8] sm:$0xff] }
  0x39   :  { %641 = vmatpush3.msra.mxu0 %v103_v3  ;;  %652 = vmatpush3.msra.mxu1 %v231_v8  ;;  %v595_v45 = vld [vmem:[#allocation4] ss:$0 sm:$0xff]  ;;  %v352_v55 = vld [vmem:[#allocation7] sm:$0xff]  ;;  %v596_v56 = vld [vmem:[#allocation6] ss:$0 sm:$0xff] }
  0x3a   :  { %642 = vmatprep.subr.mxu0 %v816_v0  ;;  %653 = vmatprep.subr.mxu1 %v816_v0  ;;  %v359_v48 = vld [vmem:[#allocation7 + $0x38] sm:$0xff] }
  0x3b   :  { %643 = vmatpush3.msra.mxu0 %v102_v4  ;;  %654 = vmatpush3.msra.mxu1 %v230_v9  ;;  %v355_v52 = vld [vmem:[#allocation7 + $0x18] sm:$0xff] }
  0x3c   :  { %645 = vmatmul.mubr.msk.f32.vlgmr.msra.gmra.mxu0 %vm113_vm1, %v101_v5  ;;  %666 = vmatprep.subr.mxu0 %v816_v0 }
  0x3d   :  { %682 = vmatprep.mubr.msk.f32.mxu0 %vm817_vm0, %v816_v0  ;;  %655 = vmatprep.subr.mxu1 %v816_v0 }
  0x3e   :  { %656 = vmatpush3.msra.mxu1 %v229_v10  ;;  %667 = vmatpush3.msra.mxu0 %v359_v48 }
  0x3f   :  { %657 = vmatprep.subr.mxu1 %v816_v0  ;;  %668 = vmatprep.subr.mxu0 %v816_v0 }
  0x40   :  { %658 = vmatpush3.msra.mxu1 %v228_v11  ;;  %669 = vmatpush3.msra.mxu0 %v358_v49 }
  0x41   :  { %659 = vmatprep.subr.mxu1 %v816_v0  ;;  %670 = vmatprep.subr.mxu0 %v816_v0 }
  0x42   :  { %660 = vmatpush3.msra.mxu1 %v227_v12  ;;  %671 = vmatpush3.msra.mxu0 %v357_v50 }
  0x43   :  { %661 = vmatprep.subr.mxu1 %v816_v0  ;;  %672 = vmatprep.subr.mxu0 %v816_v0 }
  0x44   :  { %662 = vmatpush3.msra.mxu1 %v226_v13  ;;  %673 = vmatpush3.msra.mxu0 %v356_v51 }
  0x45   :  { %685 = vmatprep.subr.mxu1 %v816_v0  ;;  %674 = vmatprep.subr.mxu0 %v816_v0 }
  0x46   :  { %675 = vmatpush3.msra.mxu0 %v355_v52 }
  0x47   :  { %676 = vmatprep.subr.mxu0 %v816_v0 }
  0x48   :  { %677 = vmatpush3.msra.mxu0 %v354_v53 }
  0x49   :  { %678 = vmatprep.subr.mxu0 %v816_v0 }
  0x4a   :  { %679 = vmatpush3.msra.mxu0 %v353_v54 }
  0x4b   :  { %680 = vmatprep.subr.mxu0 %v816_v0 }
  0x4c   :  { %681 = vmatpush3.msra.mxu0 %v352_v55 }
  0xfc   :  { %v183_v15 = vpop.f32.mrf.mxu0 }
  0xfd   :  { %v184_v16 = vadd.f32 %v593_v14, %v183_v15 }
  0xfe   :  { %v646_v17 = vpop.f32.mrf.mxu0 }
  0xff   :  { %v187_v18 = vmax.f32 %v184_v16, 0.0  ;;  %v333_v17 = vld [vmem:[%s1050_s7] sm:$0x1] }
 0x101   :  { %v189_v19 = vsel %vm188_vm2, %v187_v18, 0.0 }
 0x102   :  { %v190_v20 = vrot.slane %v189_v19, 4 }
 0x104   :  { %v191_v21 = vadd.f32 %v190_v20, %v189_v19 }
 0x106   :  { %v192_v22 = vrot.slane %v191_v21, 2 }
 0x108   :  { %v193_v23 = vadd.f32 %v192_v22, %v191_v21  ;;  %v598_v21 = vld [vmem:[%s1051_s8] ss:$0 sm:$0xff] }
 0x10a   :  { %v194_v24 = vrot.slane %v193_v23, 1 }
 0x10c   :  { %v195_v25 = vadd.f32 %v194_v24, %v193_v23  ;;  %v485_v24 = vld [vmem:[%s1056_s13 + $0x38] sm:$0xff] }
 0x10e   :  { %v196_v26 = vmul.f32 0.125, %v195_v25  ;;  %v484_v25 = vld [vmem:[%s1056_s13 + $0x30] sm:$0xff] }
 0x110   :  { %v197_v27 = vsub.f32 %v187_v18, %v196_v26  ;;  %v483_v26 = vld [vmem:[%s1056_s13 + $0x28] sm:$0xff] }
 0x112   :  { %v198_v28 = vmul.f32 %v197_v27, %v197_v27 }
 0x114   :  { %v199_v29 = vsel %vm188_vm2, %v198_v28, 0.0  ;;  %v481_v28 = vld [vmem:[%s1056_s13 + $0x18] sm:$0xff] }
 0x115   :  { %v200_v30 = vrot.slane %v199_v29, 4 }
 0x117   :  { %v201_v31 = vadd.f32 %v200_v30, %v199_v29  ;;  %v480_v29 = vld [vmem:[%s1056_s13 + $0x10] sm:$0xff]  ;;  %v479_v30 = vld [vmem:[%s1056_s13 + $0x8] sm:$0xff] }
 0x119   :  { %v202_v32 = vrot.slane %v201_v31, 2 }
 0x11b   :  { %v203_v33 = vadd.f32 %v202_v32, %v201_v31  ;;  %v478_v31 = vld [vmem:[%s1056_s13] sm:$0xff] }
 0x11c   :  { %v599_v32 = vld [vmem:[%s1053_s10] ss:$0 sm:$0xff] }
 0x11d   :  { %v204_v34 = vrot.slane %v203_v33, 1 }
 0x11f   :  { %v205_v35 = vadd.f32 %v204_v34, %v203_v33 }
 0x121   :  { %v206_v36 = vmul.f32 0.125, %v205_v35 }
 0x123   :  { %v208_v37 = vadd.f32 1e-05, %v206_v36 }
 0x125   :  { %714 = vrsqrt.f32 %v208_v37 }
 0x132   :  { %v715_v42 = vpop.eup %714 }
 0x133   :  { %v210_v43 = vmul.f32 %v715_v42, %v207_v40 }
 0x135   :  { %v215_v44 = vrot.slane %v210_v43, %v967_v41 }
 0x137   :  { %v217_v46 = vmul.f32 %v215_v44, %v197_v27  ;;  %v482_v27 = vld [vmem:[%s1056_s13 + $0x20] sm:$0xff] }
 0x139   :  { %v225_v47 = vadd.f32 %v595_v45, %v217_v46 }
 0x13b   :  { %664 = vmatmul.mubr.msk.f32.vlgmr.msra.gmra.mxu1 %vm188_vm2, %v225_v47 }
 0x13c   :  { %701 = vmatprep.mubr.msk.f32.mxu1 %vm817_vm0, %v816_v0  ;;  %686 = vmatpush3.msra.mxu1 %v485_v24 }
 0x13d   :  { %687 = vmatprep.subr.mxu1 %v816_v0 }
 0x13e   :  { %688 = vmatpush3.msra.mxu1 %v484_v25 }
 0x13f   :  { %689 = vmatprep.subr.mxu1 %v816_v0 }
 0x140   :  { %690 = vmatpush3.msra.mxu1 %v483_v26 }
 0x141   :  { %691 = vmatprep.subr.mxu1 %v816_v0 }
 0x142   :  { %692 = vmatpush3.msra.mxu1 %v482_v27 }
 0x143   :  { %693 = vmatprep.subr.mxu1 %v816_v0 }
 0x144   :  { %694 = vmatpush3.msra.mxu1 %v481_v28 }
 0x145   :  { %695 = vmatprep.subr.mxu1 %v816_v0 }
 0x146   :  { %696 = vmatpush3.msra.mxu1 %v480_v29 }
 0x147   :  { %697 = vmatprep.subr.mxu1 %v816_v0 }
 0x148   :  { %698 = vmatpush3.msra.mxu1 %v479_v30 }
 0x149   :  { %699 = vmatprep.subr.mxu1 %v816_v0 }
 0x14a   :  { %700 = vmatpush3.msra.mxu1 %v478_v31 }
 0x1fb   :  { %v310_v57 = vpop.f32.mrf.mxu1 }
 0x1fc   :  { %v311_v58 = vadd.f32 %v596_v56, %v310_v57  ;;  %v459_v56 = vld [vmem:[%s1054_s11] sm:$0x1]  ;;  %s818_s11 = smov 1  }
 0x1fd   :  { %v665_v59 = vpop.f32.mrf.mxu1 }
 0x1fe   :  { %v314_v60 = vmax.f32 %v311_v58, 0.0 }
 0x200   :  { %v315_v61 = vsel %vm188_vm2, %v314_v60, 0.0 }
 0x201   :  { %v316_v62 = vrot.slane %v315_v61, 4 }
 0x203   :  { %v317_v63 = vadd.f32 %v316_v62, %v315_v61 }
 0x205   :  { %v318_v1 = vrot.slane %v317_v63, 2 }
 0x207   :  { %v319_v2 = vadd.f32 %v318_v1, %v317_v63  ;;  %v602_v63 = vld [vmem:[%s1057_s14] ss:$0 sm:$0xff] }
 0x209   :  { %v320_v3 = vrot.slane %v319_v2, 1 }
 0x20b   :  { %v321_v4 = vadd.f32 %v320_v3, %v319_v2 }
 0x20d   :  { %v322_v5 = vmul.f32 0.125, %v321_v4 }
 0x20f   :  { %v323_v6 = vsub.f32 %v314_v60, %v322_v5  ;;  %v601_v60 = vld [vmem:[%s1055_s12] ss:$0 sm:$0xff]  ;;  %s819_s12 = smov 127  }
 0x211   :  { %v324_v7 = vmul.f32 %v323_v6, %v323_v6 }
 0x213   :  { %v325_v8 = vsel %vm188_vm2, %v324_v7, 0.0 }
 0x214   :  { %v326_v9 = vrot.slane %v325_v8, 4 }
 0x216   :  { %v327_v10 = vadd.f32 %v326_v9, %v325_v8 }
 0x218   :  { %v328_v11 = vrot.slane %v327_v10, 2 }
 0x21a   :  { %v329_v12 = vadd.f32 %v328_v11, %v327_v10 }
 0x21c   :  { %v330_v13 = vrot.slane %v329_v12, 1 }
 0x21e   :  { %v331_v14 = vadd.f32 %v330_v13, %v329_v12 }
 0x220   :  { %v332_v15 = vmul.f32 0.125, %v331_v14 }
 0x222   :  { %v334_v16 = vadd.f32 1e-05, %v332_v15 }
 0x224   :  { %716 = vrsqrt.f32 %v334_v16 }
 0x231   :  { %v717_v18 = vpop.eup %716 }
 0x232   :  { %v336_v19 = vmul.f32 %v717_v18, %v333_v17 }
 0x234   :  { %v341_v20 = vrot.slane %v336_v19, %v967_v41 }
 0x236   :  { %v343_v22 = vmul.f32 %v341_v20, %v323_v6 }
 0x238   :  { %v351_v23 = vadd.f32 %v598_v21, %v343_v22 }
 0x23a   :  { %683 = vmatmul.mubr.msk.f32.vlgmr.msra.gmra.mxu0 %vm188_vm2, %v351_v23 }
 0x2fa   :  { %v436_v33 = vpop.f32.mrf.mxu0 }
 0x2fb   :  { %v437_v34 = vadd.f32 %v599_v32, %v436_v33 }
 0x2fc   :  { %v684_v35 = vpop.f32.mrf.mxu0 }
 0x2fd   :  { %v440_v36 = vmax.f32 %v437_v34, 0.0 }
 0x2ff   :  { %v441_v37 = vsel %vm188_vm2, %v440_v36, 0.0 }
 0x300   :  { %v442_v38 = vrot.slane %v441_v37, 4 }
 0x302   :  { %v443_v39 = vadd.f32 %v442_v38, %v441_v37 }
 0x304   :  { %v444_v40 = vrot.slane %v443_v39, 2 }
 0x306   :  { %v445_v42 = vadd.f32 %v444_v40, %v443_v39 }
 0x308   :  { %v446_v0 = vrot.slane %v445_v42, 1 }
 0x30a   :  { %v447_v43 = vadd.f32 %v446_v0, %v445_v42 }
 0x30c   :  { %v448_v44 = vmul.f32 0.125, %v447_v43 }
 0x30e   :  { %v449_v45 = vsub.f32 %v440_v36, %v448_v44 }
 0x310   :  { %v450_v46 = vmul.f32 %v449_v45, %v449_v45 }
 0x312   :  { %v451_v47 = vsel %vm188_vm2, %v450_v46, 0.0 }
 0x313   :  { %v452_v48 = vrot.slane %v451_v47, 4 }
 0x315   :  { %v453_v49 = vadd.f32 %v452_v48, %v451_v47 }
 0x317   :  { %v454_v50 = vrot.slane %v453_v49, 2 }
 0x319   :  { %v455_v51 = vadd.f32 %v454_v50, %v453_v49 }
 0x31b   :  { %v456_v52 = vrot.slane %v455_v51, 1 }
 0x31d   :  { %v457_v53 = vadd.f32 %v456_v52, %v455_v51 }
 0x31f   :  { %v458_v54 = vmul.f32 0.125, %v457_v53 }
 0x321   :  { %v460_v55 = vadd.f32 1e-05, %v458_v54 }
 0x323   :  { %718 = vrsqrt.f32 %v460_v55 }
 0x330   :  { %v719_v57 = vpop.eup %718 }
 0x331   :  { %v462_v58 = vmul.f32 %v719_v57, %v459_v56 }
 0x333   :  { %v467_v59 = vrot.slane %v462_v58, %v967_v41 }
 0x335   :  { %v469_v61 = vmul.f32 %v467_v59, %v449_v45 }
 0x337   :  { %v477_v62 = vadd.f32 %v601_v60, %v469_v61 }
 0x339   :  { %702 = vmatmul.mubr.msk.f32.vlgmr.msra.gmra.mxu1 %vm188_vm2, %v477_v62 }
 0x3f9   :  { %v562_v1 = vpop.f32.mrf.mxu1 }
 0x3fa   :  { %v563_v2 = vadd.f32 %v602_v63, %v562_v1 }
 0x3fb   :  { %v703_v3 = vpop.f32.mrf.mxu1 }
 0x3fc   :  { %v566_v4 = vmax.f32 %v563_v2, 0.0 }
 0x3fe   :  { %568 = vrot.lane.b32.xlu0 %v566_v4, %s818_s11 }
 0x470   :  { %v569_v5 = vpop.permute.xlu0 %568 }
 0x471   :  { %v571_v41 = vsub.f32 %v566_v4, %v569_v5 }
 0x473   :  { %v572_v6 = vmul.f32 1.442695, %v571_v41 }
 0x475   :  { %720 = vpow2.f32 %v572_v6 }
 0x482   :  { %v721_v7 = vpop.eup %720 }
 0x483   :  { %v574_v8 = vadd.f32 1.0, %v721_v7 }
 0x485   :  { %722 = vrcp.f32 %v574_v8 }
 0x492   :  { %v723_v9 = vpop.eup %722 }
 0x493   :  { %578 = vrot.lane.b32.xlu0 %v723_v9, %s819_s12  ;;  %v583_v11 = vsub.f32 1.0, %v723_v9 }
 0x505   :  { %v579_v10 = vpop.permute.xlu0 %578 }
 0x506   :  { %582 = vst.msk [vmem:[%s1058_s15] sm:$0xff] %vm581_vm3, %v579_v10 }
 0x507   :  { %585 = vst.msk [vmem:[%s1058_s15] sm:$0xff] %vm584_vm4, %v583_v11 }
 0x508   :  { %590 = vsyncpa [#allocation3], 1 }
 0x509   :  { %591 = vsyncpa [#allocation5], 1 }
 0x50a   :  { %592 = vsyncpa [#allocation8], 1 }

</bundles_post_ra>
